<compile_context>
chip_gen: v5e
topology: v5e:2x2
jax: 0.10.0
libtpu: 0.0.40
codegen_flags: <defaults>
</compile_context>

<pallas_src>
import jax
import jax.numpy as jnp
from jax.experimental import pallas as pl
from jax.experimental.pallas import tpu as pltpu

LANE = 128


def _round_up(n, m):
    return ((n + m - 1) // m) * m


def _pick_tile(batch, tm_cap=1024):
    """Pick a lane-aligned batch tile; keep grid >= 2 when the batch allows (v7x TCs)."""
    bp = _round_up(batch, LANE)
    if bp >= 2 * LANE:
        half = max(LANE, (bp // 2) // LANE * LANE)
        tm = min(tm_cap, half)
    else:
        tm = LANE
    bp = _round_up(bp, tm)
    return tm, bp


def mlp_kernel(xT_ref, w1T_ref, b1_ref, w2T_ref, b2_ref, w3_ref, b3_ref, o_ref):
    tm = xT_ref.shape[1]          # batch tile (lane axis), static
    in_dim = xT_ref.shape[0]
    h1_dim = w1T_ref.shape[0]
    h2_dim = w2T_ref.shape[0]
    out_dim = b3_ref.shape[0]
    outp = o_ref.shape[0]

    xT = xT_ref[...]              # (IN, TM)  batch lane-dense
    w1T = w1T_ref[...]            # (H1, IN)

    # ---- Layer 1: Linear + Tanh on the VPU (K = IN is tiny). ----
    # x row k is a cheap sublane broadcast; the w1 column broadcast happens only
    # IN (=2) times per tile, amortized over TM lanes.
    acc = jnp.broadcast_to(b1_ref[...], (h1_dim, tm))      # b1 is (H1, 1)
    for k in range(in_dim):                                 # static unroll (IN == 2)
        acc = acc + w1T[:, k:k + 1] * xT[k:k + 1, :]
    h1 = jnp.tanh(acc)                                      # (H1, TM)

    # ---- Layer 2: one small MXU dot, lane-dense (H2, TM) result + Tanh. ----
    h2 = jnp.tanh(
        jnp.dot(w2T_ref[...], h1, preferred_element_type=jnp.float32)
        + b2_ref[...]                                       # (H2, 1) broadcast over lanes
    )                                                       # (H2, TM)

    # ---- Layer 3: out_num-wide head + Sigmoid. ----
    if out_dim == 1:
        # Single output: sublane (XLU) reduction instead of a padded MXU dot.
        y = jnp.sum(w3_ref[...] * h2, axis=0, keepdims=True) + b3_ref[...]   # (1, TM)
    else:
        y = (jnp.dot(w3_ref[...].T, h2, preferred_element_type=jnp.float32)
             + b3_ref[...])                                  # (OUT, TM)
    sig = jax.nn.sigmoid(y)                                  # tiny EUP cost (OUT rows)

    # Lane-dense (OUTP, TM) store; the wrapper slices the first OUT rows.
    if out_dim == outp:
        o_ref[...] = sig
    elif out_dim == 1:
        o_ref[...] = jnp.broadcast_to(sig, (outp, tm))
    else:
        o_ref[...] = jnp.concatenate(
            [sig, jnp.zeros((outp - out_dim, tm), sig.dtype)], axis=0)


def classification2d_forward(x, params, *, tm_cap=1024):
    """x: (B, input_num) f32.  params: dict of w1,b1,w2,b2,w3,b3 in x @ W + b layout.
    Returns (B, output_num) f32."""
    f32 = jnp.float32
    w1, b1 = params["w1"], params["b1"]
    w2, b2 = params["w2"], params["b2"]
    w3, b3 = params["w3"], params["b3"]

    in_dim, h1_dim = w1.shape
    h2_dim = w2.shape[1]
    out_dim = w3.shape[1]

    # Transposed parameter layout (hidden dims on sublanes, no padding needed).
    w1T = jnp.asarray(w1, f32).T                      # (H1, IN)
    b1c = jnp.asarray(b1, f32).reshape(h1_dim, 1)
    w2T = jnp.asarray(w2, f32).T                      # (H2, H1)
    b2c = jnp.asarray(b2, f32).reshape(h2_dim, 1)
    w3c = jnp.asarray(w3, f32)                        # (H2, OUT) column(s)
    b3c = jnp.asarray(b3, f32).reshape(out_dim, 1)

    B = x.shape[0]
    tm, Bp = _pick_tile(B, tm_cap)
    xT = jnp.asarray(x, f32).T                        # (IN, B): batch -> lanes
    if Bp != B:
        xT = jnp.pad(xT, ((0, 0), (0, Bp - B)))       # zero cols are exact; sliced off

    outp = _round_up(max(out_dim, 1), 8)              # small lane-dense output slab

    const = lambda i: (0, 0)                          # weights: same block every step
    out_slab = pl.pallas_call(
        mlp_kernel,
        out_shape=jax.ShapeDtypeStruct((outp, Bp), f32),
        grid=(Bp // tm,),
        in_specs=[
            pl.BlockSpec((in_dim, tm), lambda i: (0, i)),   # xT batch tiles, pipelined
            pl.BlockSpec((h1_dim, in_dim), const),          # w1T  (VMEM-resident)
            pl.BlockSpec((h1_dim, 1), const),               # b1
            pl.BlockSpec((h2_dim, h1_dim), const),          # w2T
            pl.BlockSpec((h2_dim, 1), const),               # b2
            pl.BlockSpec((h2_dim, out_dim), const),         # w3 column(s)
            pl.BlockSpec((out_dim, 1), const),              # b3
        ],
        out_specs=pl.BlockSpec((outp, tm), lambda i: (0, i)),
        compiler_params=pltpu.CompilerParams(
            dimension_semantics=("parallel",),        # both TCs on v7x (grid kept >= 2)
            vmem_limit_bytes=32 * 1024 * 1024,        # tiny tiles; explicit budget
        ),
    )(xT, w1T, b1c, w2T, b2c, w3c, b3c)

    return out_slab[:out_dim, :B].T                   # (B, OUT)


def init_params(key, input_num, num_hidden1, num_hidden2, output_num):
    """Deterministic init mimicking nn.Linear default U(-1/sqrt(fan_in), 1/sqrt(fan_in))."""
    ks = jax.random.split(key, 6)

    def linear(kw, kb, fan_in, fan_out):
        bound = 1.0 / jnp.sqrt(jnp.float32(fan_in))
        w = jax.random.uniform(kw, (fan_in, fan_out), jnp.float32, -bound, bound)
        b = jax.random.uniform(kb, (1, fan_out), jnp.float32, -bound, bound)
        return w, b

    w1, b1 = linear(ks[0], ks[1], input_num, num_hidden1)
    w2, b2 = linear(ks[2], ks[3], num_hidden1, num_hidden2)
    w3, b3 = linear(ks[4], ks[5], num_hidden2, output_num)
    return {"w1": w1, "b1": b1, "w2": w2, "b2": b2, "w3": w3, "b3": b3}


def reference_forward(x, p):
    hp = jax.lax.Precision.HIGHEST
    h1 = jnp.tanh(jnp.dot(x, p["w1"], precision=hp) + p["b1"])
    h2 = jnp.tanh(jnp.dot(h1, p["w2"], precision=hp) + p["b2"])
    y = jnp.dot(h2, p["w3"], precision=hp) + p["b3"]
    return jax.nn.sigmoid(y)


if __name__ == "__main__":
    key = jax.random.PRNGKey(0)
    k_x, k_p = jax.random.split(key)

    # Module-consistent sizes: input_num=2 (2D classification), hidden 32/16, 1 output.
    # batch=512 keeps the data tiny (4 KiB) while still giving grid=(2,) so the
    # "parallel" batch axis exercises both TensorCores on v7x.
    input_num, num_hidden1, num_hidden2, output_num = 2, 32, 16, 1
    batch = 512

    x = jax.random.normal(k_x, (batch, input_num), jnp.float32)
    params = init_params(k_p, input_num, num_hidden1, num_hidden2, output_num)

    out = classification2d_forward(x, params)
    out = jax.block_until_ready(out)

    ref = reference_forward(x, params)
    assert out.shape == (batch, output_num)
    max_err = float(jnp.max(jnp.abs(out - ref)))
    assert jnp.allclose(out, ref, atol=1e-4, rtol=1e-4), max_err

    print("KERNEL_OK")
</pallas_src>

<mosaic_0001>
module attributes {stable_mosaic.version = 11 : i64} {
  func.func @mlp_kernel(%arg0: i32, %arg1: memref<2x256xf32, #tpu.memory_space<vmem>>, %arg2: memref<32x2xf32, #tpu.memory_space<vmem>>, %arg3: memref<32x1xf32, #tpu.memory_space<vmem>>, %arg4: memref<16x32xf32, #tpu.memory_space<vmem>>, %arg5: memref<16x1xf32, #tpu.memory_space<vmem>>, %arg6: memref<16x1xf32, #tpu.memory_space<vmem>>, %arg7: memref<1x1xf32, #tpu.memory_space<vmem>>, %arg8: memref<8x256xf32, #tpu.memory_space<vmem>>) attributes {dimension_semantics = [#tpu.dimension_semantics<parallel>], iteration_bounds = array<i64: 2>, scalar_prefetch = 0 : i64, scratch_operands = 0 : i64, tpu.core_type = #tpu.core_type<tc>, window_params = [{transform_indices = @transform_0, window_bounds = array<i64: 2, 256>}, {pipeline_mode = #tpu.pipeline_mode<synchronous>, transform_indices = @transform_1, window_bounds = array<i64: 32, 2>}, {pipeline_mode = #tpu.pipeline_mode<synchronous>, transform_indices = @transform_2, window_bounds = array<i64: 32, 1>}, {pipeline_mode = #tpu.pipeline_mode<synchronous>, transform_indices = @transform_3, window_bounds = array<i64: 16, 32>}, {pipeline_mode = #tpu.pipeline_mode<synchronous>, transform_indices = @transform_4, window_bounds = array<i64: 16, 1>}, {pipeline_mode = #tpu.pipeline_mode<synchronous>, transform_indices = @transform_5, window_bounds = array<i64: 16, 1>}, {pipeline_mode = #tpu.pipeline_mode<synchronous>, transform_indices = @transform_6, window_bounds = array<i64: 1, 1>}, {transform_indices = @transform_7, window_bounds = array<i64: 8, 256>}]} {
    %c0 = arith.constant 0 : index
    %c0_0 = arith.constant 0 : index
    %0 = vector.load %arg1[%c0, %c0_0] : memref<2x256xf32, #tpu.memory_space<vmem>>, vector<2x256xf32>
    %c0_1 = arith.constant 0 : index
    %c0_2 = arith.constant 0 : index
    %1 = vector.load %arg2[%c0_1, %c0_2] : memref<32x2xf32, #tpu.memory_space<vmem>>, vector<32x2xf32>
    %c0_3 = arith.constant 0 : index
    %c0_4 = arith.constant 0 : index
    %2 = vector.load %arg3[%c0_3, %c0_4] : memref<32x1xf32, #tpu.memory_space<vmem>>, vector<32x1xf32>
    %3 = vector.shape_cast %2 : vector<32x1xf32> to vector<32x1xf32>
    %4 = vector.broadcast %3 : vector<32x1xf32> to vector<32x256xf32>
    %5 = vector.extract_strided_slice %1 {offsets = [0, 0], sizes = [32, 1], strides = [1, 1]} : vector<32x2xf32> to vector<32x1xf32>
    %6 = vector.extract_strided_slice %0 {offsets = [0, 0], sizes = [1, 256], strides = [1, 1]} : vector<2x256xf32> to vector<1x256xf32>
    %7 = vector.broadcast %5 : vector<32x1xf32> to vector<32x256xf32>
    %8 = vector.broadcast %6 : vector<1x256xf32> to vector<32x256xf32>
    %9 = arith.mulf %7, %8 : vector<32x256xf32>
    %10 = arith.addf %4, %9 : vector<32x256xf32>
    %11 = vector.extract_strided_slice %1 {offsets = [0, 1], sizes = [32, 1], strides = [1, 1]} : vector<32x2xf32> to vector<32x1xf32>
    %12 = vector.extract_strided_slice %0 {offsets = [1, 0], sizes = [1, 256], strides = [1, 1]} : vector<2x256xf32> to vector<1x256xf32>
    %13 = vector.broadcast %11 : vector<32x1xf32> to vector<32x256xf32>
    %14 = vector.broadcast %12 : vector<1x256xf32> to vector<32x256xf32>
    %15 = arith.mulf %13, %14 : vector<32x256xf32>
    %16 = arith.addf %10, %15 : vector<32x256xf32>
    %17 = math.tanh %16 : vector<32x256xf32>
    %c0_5 = arith.constant 0 : index
    %c0_6 = arith.constant 0 : index
    %18 = vector.load %arg4[%c0_5, %c0_6] : memref<16x32xf32, #tpu.memory_space<vmem>>, vector<16x32xf32>
    %cst = arith.constant dense<0.000000e+00> : vector<16x256xf32>
    %19 = tpu.matmul %18, %17, %cst {dimension_numbers = #tpu.dot_dimension_numbers<[1], [0], [0], [1], [0, 0, 1, 1], [], []>} : vector<16x32xf32>, vector<32x256xf32>, vector<16x256xf32> -> vector<16x256xf32>
    %c0_7 = arith.constant 0 : index
    %c0_8 = arith.constant 0 : index
    %20 = vector.load %arg5[%c0_7, %c0_8] : memref<16x1xf32, #tpu.memory_space<vmem>>, vector<16x1xf32>
    %21 = vector.broadcast %20 : vector<16x1xf32> to vector<16x256xf32>
    %22 = arith.addf %19, %21 : vector<16x256xf32>
    %23 = math.tanh %22 : vector<16x256xf32>
    %c0_9 = arith.constant 0 : index
    %c0_10 = arith.constant 0 : index
    %24 = vector.load %arg6[%c0_9, %c0_10] : memref<16x1xf32, #tpu.memory_space<vmem>>, vector<16x1xf32>
    %25 = vector.broadcast %24 : vector<16x1xf32> to vector<16x256xf32>
    %26 = arith.mulf %25, %23 : vector<16x256xf32>
    %cst_11 = arith.constant dense<0.000000e+00> : vector<256xf32>
    %27 = vector.multi_reduction <add>, %26, %cst_11 [0] : vector<16x256xf32> to vector<256xf32>
    %28 = vector.shape_cast %27 : vector<256xf32> to vector<1x256xf32>
    %c0_12 = arith.constant 0 : index
    %c0_13 = arith.constant 0 : index
    %29 = vector.load %arg7[%c0_12, %c0_13] : memref<1x1xf32, #tpu.memory_space<vmem>>, vector<1x1xf32>
    %30 = vector.broadcast %29 : vector<1x1xf32> to vector<1x256xf32>
    %31 = arith.addf %28, %30 : vector<1x256xf32>
    %32 = arith.negf %31 : vector<1x256xf32>
    %33 = math.exp %32 : vector<1x256xf32>
    %cst_14 = arith.constant 1.000000e+00 : f32
    %34 = vector.broadcast %cst_14 : f32 to vector<1x256xf32>
    %35 = arith.addf %34, %33 : vector<1x256xf32>
    %36 = arith.divf %34, %35 : vector<1x256xf32>
    %37 = vector.shape_cast %36 : vector<1x256xf32> to vector<1x256xf32>
    %38 = vector.broadcast %37 : vector<1x256xf32> to vector<8x256xf32>
    %c0_15 = arith.constant 0 : index
    %c0_16 = arith.constant 0 : index
    %39 = vector.load %arg8[%c0_15, %c0_16] : memref<8x256xf32, #tpu.memory_space<vmem>>, vector<8x256xf32>
    tpu.vector_store %arg8[%c0_15, %c0_16], %38 {strides = array<i32>} : memref<8x256xf32, #tpu.memory_space<vmem>>, vector<8x256xf32>,
    return
  }
  func.func @transform_0(%arg0: i32) -> (i32, i32) {
    %c0_i32 = arith.constant 0 : i32
    %c0_i32_0 = arith.constant 0 : i32
    return %c0_i32, %arg0 : i32, i32
  }
  func.func @transform_1(%arg0: i32) -> (i32, i32) {
    %c0_i32 = arith.constant 0 : i32
    %c0_i32_0 = arith.constant 0 : i32
    %c0_i32_1 = arith.constant 0 : i32
    return %c0_i32, %c0_i32_0 : i32, i32
  }
  func.func @transform_2(%arg0: i32) -> (i32, i32) {
    %c0_i32 = arith.constant 0 : i32
    %c0_i32_0 = arith.constant 0 : i32
    %c0_i32_1 = arith.constant 0 : i32
    return %c0_i32, %c0_i32_0 : i32, i32
  }
  func.func @transform_3(%arg0: i32) -> (i32, i32) {
    %c0_i32 = arith.constant 0 : i32
    %c0_i32_0 = arith.constant 0 : i32
    %c0_i32_1 = arith.constant 0 : i32
    return %c0_i32, %c0_i32_0 : i32, i32
  }
  func.func @transform_4(%arg0: i32) -> (i32, i32) {
    %c0_i32 = arith.constant 0 : i32
    %c0_i32_0 = arith.constant 0 : i32
    %c0_i32_1 = arith.constant 0 : i32
    return %c0_i32, %c0_i32_0 : i32, i32
  }
  func.func @transform_5(%arg0: i32) -> (i32, i32) {
    %c0_i32 = arith.constant 0 : i32
    %c0_i32_0 = arith.constant 0 : i32
    %c0_i32_1 = arith.constant 0 : i32
    return %c0_i32, %c0_i32_0 : i32, i32
  }
  func.func @transform_6(%arg0: i32) -> (i32, i32) {
    %c0_i32 = arith.constant 0 : i32
    %c0_i32_0 = arith.constant 0 : i32
    %c0_i32_1 = arith.constant 0 : i32
    return %c0_i32, %c0_i32_0 : i32, i32
  }
  func.func @transform_7(%arg0: i32) -> (i32, i32) {
    %c0_i32 = arith.constant 0 : i32
    %c0_i32_0 = arith.constant 0 : i32
    return %c0_i32, %arg0 : i32, i32
  }
}

</mosaic_0001>

<bundles_post_ra>
// kernel: tpu_custom_call.1
= control target key start
LH: loop header
LB: loop body
LE: loop exit
PB: predicated region body
PF: predicated region fallthrough
CT: control target
= control target key end

     0   :  { %s974_s0 = inlined_call_operand.vmem [shape: f32[2,512], index: 0, kind: input, shape index: {}]   ;;  %s975_s1 = inlined_call_operand.vmem [shape: f32[32,2], index: 1, kind: input, shape index: {}]   ;;  %s976_s2 = inlined_call_operand.vmem [shape: f32[32,1], index: 2, kind: input, shape index: {}]   ;;  %s977_s3 = inlined_call_operand.vmem [shape: f32[16,32], index: 3, kind: input, shape index: {}]   ;;  %s978_s4 = inlined_call_operand.vmem [shape: f32[16,1], index: 4, kind: input, shape index: {}]   ;;  %s979_s5 = inlined_call_operand.vmem [shape: f32[16,1], index: 5, kind: input, shape index: {}]   ;;  %s980_s6 = inlined_call_operand.<no memory space> [shape: f32[1,1], index: 6, kind: input, shape index: {}]   ;;  %s981_s7 = inlined_call_operand.hbm [shape: f32[8,512], index: 7, kind: output, shape index: {}]  }
   0x1   :  { %v12_v0 = vstv %s980_s6 }
   0x2   :  { %13 = vst [vmem:[#allocation2] sm:$0x1] %v12_v0 }
   0x3   :  { %14 = vsyncpa [#allocation4], 0 }
   0x4   :  { %16 = vsyncpa [#allocation4 + $0x1], 0  ;;  %s844_s26 = smov 0   ;;  %s846_s27 = smov 0  }
   0x5   :  { %s848_s28 = smov 0   ;;  %s850_s29 = smov 0  }
   0x6 LB: > { %s865_s6 = sadd.s32 4294967295, %s797_s29   ;;  %s626_s30 = sadd.s32 4294967294, %s797_s29   ;;  %s797_s29 = sphi %s850_s29, %s987_s29   ;;  %s793_s28 = sphi %s848_s28, %s986_s28   ;;  %s789_s27 = sphi %s846_s27, %s985_s27   ;;  %s785_s26 = sphi %s844_s26, %s984_s26  }
   0x7   : > { %s869_s8 = sadd.s32 1, %s797_s29   ;;  %s181_s9 = sadd.s32 1, %s793_s28 }
   0x8   : > { %s178_s10 = ssub.s32 %s797_s29, %s869_s8  ;;  %p191_p0 = scmp.ne.s32.totalorder %s793_s28, %s789_s27 }
   0x9   : > { %p179_p1 = scmp.eq.s32.totalorder %s178_s10, 0  ;;  %p192_p2 = scmp.eq.s32.totalorder %s865_s6, 1 }
   0xa   : > { %p197_p3 = scmp.ne.s32.totalorder %s789_s27, %s785_s26  ;;  %p198_p4 = scmp.eq.s32.totalorder %s626_s30, 1 }
   0xb   : > { %s880_s11 = scalar_select %p179_p1, %s793_s28, %s181_s9  }
   0xc   : > { %p882_p5 = por %p192_p2, %p191_p0  ;;  %p886_p6 = por %p198_p4, %p197_p3 }
   0xd   : > { %p629_p7 = scmp.ge.s32.totalorder %s797_s29, 1  ;;  %p243_p8 = scmp.lt.s32.totalorder %s797_s29, 3 }
   0xf   : > { %p244_p9 = pnand %p629_p7, %p243_p8 }
  0x10   : > { %s631_s17 = sshll.u32 (!%p244_p9), %s865_s6, 1  ;;  %s644_s19 = sshll.u32 (!%p244_p9), %s865_s6, 4 }
  0x11   : > { %247 = sbr.rel (%p244_p9) target bundleno = 373 (0x175), region = 48  ;;  %p276_p10 = scmp.lt.s32.totalorder (!%p244_p9), %s631_s17, 3 }
  0x12   : > { %s562_s22 = scalar_lea.hbm (!%p244_p9), %s981_s7, %s644_s19  ;;  %s755_s15 = scalar_lea.hbm (!%p244_p9), %s981_s7, 32 }
  0x13   : > { %s566_s6 = sshll.u32 (!%p244_p9), %s562_s22, 4  ;;  %s567_s6 = int_to_ptr.hbm [resolvable:$true] %s566_s6 }
  0x14   : > { %s749_s30 = sshra.s32 (!%p244_p9), %s567_s6, 4  ;;  %s750_s30 = int_to_ptr.hbm [resolvable:$true] %s749_s30 }
  0x15   : > { %s751_s9 = scalar_lea.hbm (!%p244_p9), %s750_s30, 16  ;;  %p756_p0 = scmp.lt.s32.totalorder (!%p244_p9), %s750_s30, %s981_s7 }
  0x16   : > { %v289_v1 = vld [vmem:[%s976_s2 + $0x10] sm:$0xff]  ;;  %v286_v2 = vld [vmem:[%s975_s1 + $0x18] sm:$0xff]  ;;  %v799_v4 = vmov 0   ;;  %v284_v5 = vld [vmem:[%s975_s1 + $0x8] sm:$0xff]  ;;  %v800_v7 = vmov 1   ;;  %s989_s17 = smov (!%p276_p10, %s631_s17), 3  ;;  %p752_p11 = scmp.ne.s32.totalorder %s750_s30, %s751_s9 }
  0x17   : > { %v285_v3 = vld [vmem:[%s975_s1 + $0x10] sm:$0xff]  ;;  %697 = vset.pattern.permute.xlu2 %v799_v4  ;;  %695 = vset.pattern.permute.xlu1 %v799_v4  ;;  %v290_v6 = vld [vmem:[%s976_s2 + $0x18] sm:$0xff]  ;;  %v283_v8 = vld [vmem:[%s975_s1] sm:$0xff]  ;;  %s632_s18 = sshll.u32 %s989_s17, 1  ;;  %vm414_vm0 = vcmask 261120   ;;  %s272_s17 = sand.u32 1, %s789_s27  }
  0x18   : > { %694 = vset.pattern.permute.xlu0 %v799_v4  ;;  %303 = vperm.xlu2 %697, %v289_v1   ;;  %v288_v9 = vld [vmem:[%s976_s2 + $0x8] sm:$0xff]  ;;  %v287_v10 = vld [vmem:[%s976_s2] sm:$0xff]  ;;  %s279_s21 = scalar_lea.vmem %s974_s0, %s632_s18  ;;  %s630_s18 = sshll.u32 %s272_s17, 4 }
  0x19   : > { %328 = vperm.xlu0 %694, %v286_v2   ;;  %323 = vperm.xlu1 %695, %v285_v3   ;;  %v403_v11 = vld [vmem:[%s978_s4 + $0x8] sm:$0xff]  ;;  %v501_v12 = vld [vmem:[#allocation2] sm:$0x1]  ;;  %s274_s23 = scalar_lea.vmem [#allocation3], %s630_s18  ;;  %s551_s25 = scalar_lea.sflag [#allocation4], %s272_s17 }
  0x1a   : > { %v282_v14 = vld [vmem:[%s279_s21] sm:$0xf]  ;;  %v472_v50 = vld [vmem:[%s979_s5 + $0x8] sm:$0xff]  ;;  %s564_s24 = sshll.u32 %s274_s23, 4  ;;  %p753_p12 = pnand %p752_p11, %p882_p5  ;;  %s565_s24 = int_to_ptr.vmem [resolvable:$true] %s564_s24 }
  0x1b   : > { %v332_v17 = vperm.slane %v282_v14, 0  ;;  %v333_v18 = vperm.slane %v282_v14, 2  ;;  %v370_v19 = vperm.slane %v282_v14, 1  ;;  %v371_v20 = vperm.slane %v282_v14, 3  ;;  %v402_v36 = vld [vmem:[%s978_s4] sm:$0xff]  ;;  %p757_p1 = scmp.lt.s32.totalorder %s755_s15, %s751_s9 }
  0x1c   : > { %v471_v37 = vld [vmem:[%s979_s5] sm:$0xff]  ;;  %p754_p13 = pneg %p753_p12 }
  0x1d   : > { %v336_v21 = vperm.slane %v332_v17, 0  ;;  %v337_v22 = vperm.slane %v333_v18, 0  ;;  %v374_v24 = vperm.slane %v370_v19, 1  ;;  %v375_v25 = vperm.slane %v371_v20, 1  ;;  %v400_v14 = vld [vmem:[%s977_s3] sm:$0xff]  ;;  %p758_p2 = por %p757_p1, %p756_p0 }
  0x1f   : > { %p759_p3 = pnand %p758_p2, %p754_p13 }
  0x20   : > { %318 = vperm.xlu2 %697, %v284_v5  }
  0x21   : > { %308 = vperm.xlu0 %694, %v290_v6   ;;  %696 = vset.pattern.permute.xlu1 %v800_v7 }
  0x22   : > { %367 = vperm.xlu1 %696, %v286_v2  }
  0x28   : > { %313 = vperm.xlu2 %697, %v283_v8  }
  0x29   : > { %698 = vset.pattern.permute.xlu0 %v800_v7 }
  0x2a   : > { %363 = vperm.xlu0 %698, %v285_v3   ;;  %699 = vset.pattern.permute.xlu1 %v799_v4 }
  0x2b   : > { %298 = vperm.xlu1 %699, %v288_v9  }
  0x30   : > { %293 = vperm.xlu2 %697, %v287_v10  }
  0x32   : > { %355 = vperm.xlu0 %698, %v283_v8  }
  0x33   : > { %700 = vset.pattern.permute.xlu1 %v800_v7 }
  0x34   : > { %359 = vperm.xlu1 %700, %v284_v5  }
  0x38   : > { %411 = vperm.xlu2 %697, %v403_v11  }
  0x3a   : > { %702 = vset.pattern.permute.xlu0 %v799_v4 }
  0x3b   : > { %475 = vperm.xlu0 %702, %v471_v37  }
  0x3c   : > { %701 = vset.pattern.permute.xlu1 %v799_v4 }
  0x3d   : > { %406 = vperm.xlu1 %701, %v402_v36  }
  0x40   : > { %504 = vperm.xlu2 %697, %v501_v12   ;;  %v401_v12 = vld [vmem:[%s977_s3 + $0x8] sm:$0xff] }
  0x45   : > { %480 = vperm.xlu1 %701, %v472_v50  }
  0x72   : > { %v304_v13 = vpop.permute.xlu2 %303 }
  0x7a   : > { %v319_v23 = vpop.permute.xlu2 %318 }
  0x7b   : > { %v340_v55 = vmul.f32 %v336_v21, %v319_v23  ;;  %v341_v56 = vmul.f32 %v337_v22, %v319_v23 }
  0x82   : > { %v314_v40 = vpop.permute.xlu2 %313 }
  0x83   : > { %v338_v52 = vmul.f32 %v336_v21, %v314_v40  ;;  %v339_v53 = vmul.f32 %v337_v22, %v314_v40 }
  0x8a   : > { %v294_v57 = vpop.permute.xlu2 %293 }
  0x8b   : > { %v329_v15 = vpop.permute.xlu0 %328  ;;  %v324_v16 = vpop.permute.xlu1 %323  ;;  %v346_v59 = vadd.f32 %v338_v52, %v294_v57  ;;  %v347_v4 = vadd.f32 %v339_v53, %v294_v57 }
  0x8c   : > { %v344_v26 = vmul.f32 %v336_v21, %v329_v15  ;;  %v345_v27 = vmul.f32 %v337_v22, %v329_v15  ;;  %v342_v38 = vmul.f32 %v336_v21, %v324_v16  ;;  %v343_v39 = vmul.f32 %v337_v22, %v324_v16 }
  0x8e   : > { %v350_v42 = vadd.f32 %v342_v38, %v304_v13  ;;  %v351_v43 = vadd.f32 %v343_v39, %v304_v13 }
  0x92   : > { %v412_v20 = vpop.permute.xlu2 %411 }
  0x93   : > { %v309_v28 = vpop.permute.xlu0 %308 }
  0x94   : > { %v352_v29 = vadd.f32 %v344_v26, %v309_v28  ;;  %v353_v30 = vadd.f32 %v345_v27, %v309_v28  ;;  %v368_v31 = vpop.permute.xlu1 %367 }
  0x95   : > { %v382_v32 = vmul.f32 %v374_v24, %v368_v31  ;;  %v383_v33 = vmul.f32 %v375_v25, %v368_v31 }
  0x97   : > { %v390_v34 = vadd.f32 %v382_v32, %v352_v29  ;;  %v391_v35 = vadd.f32 %v383_v33, %v353_v30 }
  0x99   : > { %703 = vtanh.f32 %v390_v34 }
  0x9a   : > { %705 = vtanh.f32 %v391_v35 }
  0x9c   : > { %v364_v41 = vpop.permute.xlu0 %363 }
  0x9d   : > { %v380_v44 = vmul.f32 %v374_v24, %v364_v41  ;;  %v381_v45 = vmul.f32 %v375_v25, %v364_v41  ;;  %v299_v46 = vpop.permute.xlu1 %298 }
  0x9e   : > { %v348_v63 = vadd.f32 %v340_v55, %v299_v46  ;;  %v349_v0 = vadd.f32 %v341_v56, %v299_v46 }
  0x9f   : > { %v704_v47 = vpop.eup %703  ;;  %v388_v48 = vadd.f32 %v380_v44, %v350_v42  ;;  %v389_v49 = vadd.f32 %v381_v45, %v351_v43  ;;  %v505_v44 = vpop.permute.xlu2 %504 }
  0xa0   : > { %v706_v51 = vpop.eup %705  ;;  %433 = vmatpush.msra.mxu0 %v704_v47  ;;  %645 = vmatpush.msra.mxu2 %v704_v47 }
  0xa1   : > { %707 = vtanh.f32 %v388_v48  ;;  %456 = vmatpush.msra.mxu1 %v706_v51  ;;  %649 = vmatpush.msra.mxu3 %v706_v51  ;;  %v507_v48 = vperm.slane %v505_v44, 0 }
  0xa2   : > { %709 = vtanh.f32 %v389_v49 }
  0xa4   : > { %v356_v54 = vpop.permute.xlu0 %355 }
  0xa5   : > { %v376_v58 = vmul.f32 %v374_v24, %v356_v54  ;;  %v377_v60 = vmul.f32 %v375_v25, %v356_v54 }
  0xa6   : > { %v360_v61 = vpop.permute.xlu1 %359 }
  0xa7   : > { %v708_v62 = vpop.eup %707  ;;  %v378_v1 = vmul.f32 %v374_v24, %v360_v61  ;;  %v379_v2 = vmul.f32 %v375_v25, %v360_v61  ;;  %v384_v5 = vadd.f32 %v376_v58, %v346_v59  ;;  %v385_v8 = vadd.f32 %v377_v60, %v347_v4 }
  0xa8   : > { %v710_v3 = vpop.eup %709  ;;  %434 = vmatpush.msra.mxu0 %v708_v62  ;;  %646 = vmatpush.msra.mxu2 %v708_v62 }
  0xa9   : > { %v386_v6 = vadd.f32 %v378_v1, %v348_v63  ;;  %v387_v7 = vadd.f32 %v379_v2, %v349_v0  ;;  %457 = vmatpush.msra.mxu1 %v710_v3  ;;  %650 = vmatpush.msra.mxu3 %v710_v3 }
  0xab   : > { %711 = vtanh.f32 %v386_v6 }
  0xac   : > { %713 = vtanh.f32 %v387_v7 }
  0xad   : > { %715 = vtanh.f32 %v384_v5  ;;  %v476_v26 = vpop.permute.xlu0 %475 }
  0xae   : > { %717 = vtanh.f32 %v385_v8 }
  0xaf   : > { %v407_v15 = vpop.permute.xlu1 %406 }
  0xb1   : > { %v712_v9 = vpop.eup %711 }
  0xb2   : > { %v714_v10 = vpop.eup %713  ;;  %435 = vmatpush.msra.mxu0 %v712_v9  ;;  %647 = vmatpush.msra.mxu2 %v712_v9 }
  0xb3   : > { %v716_v11 = vpop.eup %715  ;;  %458 = vmatpush.msra.mxu1 %v714_v10  ;;  %651 = vmatpush.msra.mxu3 %v714_v10 }
  0xb4   : > { %v718_v13 = vpop.eup %717  ;;  %436 = vmatpush.msra.mxu0 %v716_v11  ;;  %648 = vmatpush.msra.mxu2 %v716_v11 }
  0xb5   : > { %459 = vmatpush.msra.mxu1 %v718_v13  ;;  %652 = vmatpush.msra.mxu3 %v718_v13 }
  0xb6   : > { %634 = vmatmul.msk.f32.vlgmr.msra.gmra.mxu2 %vm414_vm0, %v401_v12  ;;  %636 = vmatmul.msk.f32.vlgmr.msra.gmra.mxu3 %vm414_vm0, %v401_v12 }
  0xb7   : > { %633 = vmatmul.msk.f32.vlgmr.msra.gmra.mxu0 %vm414_vm0, %v400_v14  ;;  %635 = vmatmul.msk.f32.vlgmr.msra.gmra.mxu1 %vm414_vm0, %v400_v14  ;;  %v481_v30 = vpop.permute.xlu1 %480 }
 0x134   : > { %v438_v16 = vpop.f32.mrf.mxu0  ;;  %v461_v17 = vpop.f32.mrf.mxu1 }
 0x135   : > { %v439_v18 = vadd.f32 %v438_v16, %v407_v15  ;;  %v462_v19 = vadd.f32 %v461_v17, %v407_v15 }
 0x137   : > { %719 = vtanh.f32 %v439_v18 }
 0x138   : > { %721 = vtanh.f32 %v462_v19 }
 0x139   : > { %v441_v21 = vpop.f32.mrf.mxu2  ;;  %v464_v22 = vpop.f32.mrf.mxu3 }
 0x13a   : > { %v442_v23 = vadd.f32 %v441_v21, %v412_v20  ;;  %v465_v24 = vadd.f32 %v464_v22, %v412_v20 }
 0x13c   : > { %723 = vtanh.f32 %v442_v23 }
 0x13d   : > { %725 = vtanh.f32 %v465_v24  ;;  %v720_v25 = vpop.eup %719 }
 0x13e   : > { %v722_v27 = vpop.eup %721  ;;  %v483_v28 = vmul.f32 %v720_v25, %v476_v26 }
 0x13f   : > { %v484_v31 = vmul.f32 %v722_v27, %v476_v26 }
 0x142   : > { %v724_v29 = vpop.eup %723 }
 0x143   : > { %v726_v32 = vpop.eup %725  ;;  %v485_v33 = vmul.f32 %v724_v29, %v481_v30 }
 0x144   : > { %v486_v34 = vmul.f32 %v726_v32, %v481_v30 }
 0x145   : > { %v487_v35 = vadd.f32 %v485_v33, %v483_v28 }
 0x146   : > { %v494_v36 = vadd.f32 %v486_v34, %v484_v31 }
 0x147   : > { %v488_v37 = vrot.slane %v487_v35, 4 }
 0x148   : > { %v495_v38 = vrot.slane %v494_v36, 4 }
 0x149   : > { %v489_v39 = vadd.f32 %v488_v37, %v487_v35 }
 0x14a   : > { %v496_v40 = vadd.f32 %v495_v38, %v494_v36 }
 0x14b   : > { %v490_v41 = vrot.slane %v489_v39, 2 }
 0x14c   : > { %v497_v42 = vrot.slane %v496_v40, 2 }
 0x14d   : > { %v491_v43 = vadd.f32 %v490_v41, %v489_v39 }
 0x14e   : > { %v498_v45 = vadd.f32 %v497_v42, %v496_v40 }
 0x14f   : > { %v492_v46 = vrot.slane %v491_v43, 1 }
 0x150   : > { %v499_v47 = vrot.slane %v498_v45, 1 }
 0x151   : > { %v493_v49 = vadd.f32 %v492_v46, %v491_v43 }
 0x152   : > { %v500_v50 = vadd.f32 %v499_v47, %v498_v45 }
 0x153   : > { %v508_v51 = vadd.f32 %v507_v48, %v493_v49 }
 0x154   : > { %v509_v52 = vadd.f32 %v507_v48, %v500_v50 }
 0x155   : > { %v637_v53 = vmul.f32 -1.442695, %v508_v51 }
 0x156   : > { %v638_v54 = vmul.f32 -1.442695, %v509_v52 }
 0x157   : > { %727 = vpow2.f32 %v637_v53 }
 0x158   : > { %729 = vpow2.f32 %v638_v54 }
 0x15d   : > { %v728_v55 = vpop.eup %727 }
 0x15e   : > { %v730_v56 = vpop.eup %729  ;;  %v516_v57 = vadd.f32 1.0, %v728_v55 }
 0x15f   : > { %v517_v58 = vadd.f32 1.0, %v730_v56 }
 0x160   : > { %731 = vrcp.f32 %v516_v57  ;;  %v529_v0 = vand.u32 2147483648, %v516_v57  ;;  %v527_v3 = vand.u32 2147483647, %v516_v57  ;;  %vm523_vm3 = vweird.f32 %v516_v57 }
 0x161   : > { %733 = vrcp.f32 %v517_v58  ;;  %v544_v4 = vand.u32 2147483648, %v517_v58  ;;  %v542_v6 = vand.u32 2147483647, %v517_v58  ;;  %vm538_vm5 = vweird.f32 %v517_v58 }
 0x162   : > { %v530_v8 = vor.u32 1.1754944e-38, %v529_v0  ;;  %vm528_vm6 = vcmp.eq.f32.partialorder %v527_v3, 8.507059e+37 }
 0x163   : > { %v545_v11 = vor.u32 1.1754944e-38, %v544_v4  ;;  %vm543_vm8 = vcmp.eq.f32.partialorder %v542_v6, 8.507059e+37 }
 0x166   : > { %v732_v59 = vpop.eup %731 }
 0x167   : > { %v734_v60 = vpop.eup %733  ;;  %v519_v61 = vmul.f32 %v732_v59, %v516_v57  ;;  %vm524_vm1 = vweird.f32 %v732_v59 }
 0x168   : > { %v534_v62 = vmul.f32 %v734_v60, %v517_v58  ;;  %vm539_vm2 = vweird.f32 %v734_v60  ;;  %vm525_vm4 = vmor %vm523_vm3, %vm524_vm1 }
 0x169   : > { %v520_v63 = vsub.f32 1.0, %v519_v61  ;;  %vm540_vm7 = vmor %vm538_vm5, %vm539_vm2 }
 0x16a   : > { %v535_v1 = vsub.f32 1.0, %v534_v62 }
 0x16b   : > { %v521_v2 = vmul.f32 %v732_v59, %v520_v63 }
 0x16c   : > { %v536_v5 = vmul.f32 %v734_v60, %v535_v1 }
 0x16d   : > { %v522_v7 = vadd.f32 %v732_v59, %v521_v2 }
 0x16e   : > { %v537_v9 = vadd.f32 %v734_v60, %v536_v5 }
 0x16f   : > { %v526_v10 = vsel %vm525_vm4, %v732_v59, %v522_v7 }
 0x170   : > { %v531_v12 = vsel %vm528_vm6, %v530_v8, %v526_v10  ;;  %v541_v13 = vsel %vm540_vm7, %v734_v60, %v537_v9 }
 0x171   : > { %v546_v14 = vsel %vm543_vm8, %v545_v11, %v541_v13  ;;  %548 = vst [vmem:[%s274_s23] sm:$0xff] %v531_v12 }
 0x172   : > { %549 = vst [vmem:[%s274_s23 + $0x8] sm:$0xff] %v546_v14 }
 0x173   : > { %762 = shalt.err (!%p759_p3)
}
 0x174   : > { %653 = dma.vmem_to_hbm [thread:$0]  (%p882_p5), %s565_s24, 256, %s567_s6, %s551_s25  }
 0x175 PF: > { %p659_p4 = scmp.ge.s32.totalorder %s797_s29, 2  ;;  %s578_s17 = sand.u32 1, %s785_s26  }
 0x176   : > { %s579_s19 = scalar_lea.sflag [#allocation4], %s578_s17 }
 0x177   : > { %p656_p7 = pnand %p659_p4, %p886_p6 }
 0x179   : > { %p657_p8 = pneg %p656_p7 }
 0x17b   : > { %780 = dma.done.wait (%p657_p8), %s579_s19, 256  }
 0x17c   : > { %782 = vsyncadd (%p657_p8), %s579_s19, 4294967040  ;;  %p19_p9 = scmp.ge.s32.totalorder %s869_s8, 4   ;;  %s984_s26 = smov %s789_s27 }
 0x17d   : > { %s985_s27 = smov %s793_s28  ;;  %s986_s28 = smov %s880_s11 }
 0x17e   : > { %s987_s29 = smov %s869_s8  ;;  %21 = sbr.rel (!%p19_p9) target bundleno = 6 (0x6), region = 83 }
 0x183   :  { %585 = vsyncpa [#allocation4], 1 }
 0x184   :  { %587 = vsyncpa [#allocation4 + $0x1], 1 }

</bundles_post_ra>
